<compile_context>
chip_gen: v6e
topology: v6e:2x2x1
jax: 0.10.0
libtpu: 0.0.40
codegen_flags: <defaults>
</compile_context>

<pallas_src>
import jax
import jax.numpy as jnp
from jax.experimental import pallas as pl
from jax.experimental.pallas import tpu as pltpu

_IN = 48          # 3 * 4 * 4
_HID = 32
_LANES = 128
_P_ROWS = 256     # rows 0:128 = W1' (bias folded), rows 128:256 = W2' (bias folded)
_ONE_LANE = _IN   # lane 48 carries the constant 1 used for bias folding


def _mlp_kernel(x_ref, p_ref, o_ref, xs_ref):
    # x_ref : (1, 48)   f32   input row
    # p_ref : (256,128) bf16  packed weights with folded biases
    # o_ref : (1, 48)   f32   output row
    # xs_ref: (1, 128)  f32   VMEM scratch used to lane-pad x in-kernel
    xs_ref[...] = jnp.zeros_like(xs_ref)
    xs_ref[0:1, 0:_IN] = x_ref[...]
    lane = jax.lax.broadcasted_iota(jnp.int32, (1, _LANES), 1)
    x_row = jnp.where(lane == _ONE_LANE, 1.0, xs_ref[...])     # set bias lane = 1
    x = x_row.astype(jnp.bfloat16)                              # (1, 128) bf16

    w1 = p_ref[0:_LANES, :]          # (128,128) bf16; row 48 = [b1 | 1 @ lane 48]
    w2 = p_ref[_LANES:_P_ROWS, :]    # (128,128) bf16; row 48 = b2

    h = jnp.dot(x, w1, preferred_element_type=jnp.float32)      # (1, 128) f32
    h = jnp.maximum(h, 0.0)          # ReLU; constant-1 lane stays 1
    y = jnp.dot(h.astype(jnp.bfloat16), w2,
                preferred_element_type=jnp.float32)             # (1, 128) f32
    o_ref[...] = y[0:1, 0:_IN].astype(o_ref.dtype)              # (1, 48)


def pack_params(w1, b1, w2, b2):
    """One-time packing of PyTorch-convention Linear params into one lane-dense
    bf16 block.  w1: (32, 48), b1: (32,), w2: (48, 32), b2: (48,)."""
    p = jnp.zeros((_P_ROWS, _LANES), jnp.float32)
    # Layer 1: h = [x | 1] @ [W1^T ; b1]; the 1.0 at (48, 48) lets the
    # constant-1 lane survive into the hidden activation (ReLU(1) == 1).
    p = p.at[0:_IN, 0:_HID].set(w1.T.astype(jnp.float32))
    p = p.at[_ONE_LANE, 0:_HID].set(b1.astype(jnp.float32))
    p = p.at[_ONE_LANE, _ONE_LANE].set(1.0)
    # Layer 2: y = [h | 1] @ [W2^T ; b2]
    p = p.at[_LANES:_LANES + _HID, 0:_IN].set(w2.T.astype(jnp.float32))
    p = p.at[_LANES + _ONE_LANE, 0:_IN].set(b2.astype(jnp.float32))
    return p.astype(jnp.bfloat16)


_vmem = pl.BlockSpec(memory_space=pltpu.MemorySpace.VMEM)


@jax.jit
def neuralnet_forward(x_nchw, packed_params):
    """x_nchw: (1, 3, 4, 4) (any float dtype); packed_params: (256, 128) bf16.
    Returns (1, 48) f32, matching NeuralNet.forward."""
    x_flat = x_nchw.astype(jnp.float32).reshape(1, _IN)   # == x.view(1, 48)
    return pl.pallas_call(
        _mlp_kernel,
        out_shape=jax.ShapeDtypeStruct((1, _IN), jnp.float32),
        in_specs=[_vmem, _vmem],
        out_specs=_vmem,
        scratch_shapes=[pltpu.VMEM((1, _LANES), jnp.float32)],
        cost_estimate=pl.CostEstimate(
            flops=2 * 2 * _LANES * _LANES,
            bytes_accessed=_IN * 4 + _P_ROWS * _LANES * 2 + _IN * 4,
            transcendentals=0),
    )(x_flat, packed_params)


if __name__ == "__main__":
    key = jax.random.PRNGKey(0)
    k_x, k_w1, k_b1, k_w2, k_b2 = jax.random.split(key, 5)

    # Input shaped like the PyTorch module expects before view(1, 48).
    x = jax.random.normal(k_x, (1, 3, 4, 4), dtype=jnp.float32)

    # Deterministic parameter init (PyTorch Linear shapes: (out, in)).
    in1, out1 = _IN, _HID
    in2, out2 = _HID, _IN
    bound1 = 1.0 / jnp.sqrt(in1)
    bound2 = 1.0 / jnp.sqrt(in2)
    w1 = jax.random.uniform(k_w1, (out1, in1), jnp.float32, -bound1, bound1)
    b1 = jax.random.uniform(k_b1, (out1,), jnp.float32, -bound1, bound1)
    w2 = jax.random.uniform(k_w2, (out2, in2), jnp.float32, -bound2, bound2)
    b2 = jax.random.uniform(k_b2, (out2,), jnp.float32, -bound2, bound2)

    # One-time parameter packing (hoisted out of the per-call path).
    packed = pack_params(w1, b1, w2, b2)
    jax.block_until_ready(packed)

    y = neuralnet_forward(x, packed)
    jax.block_until_ready(y)

    # Reference in plain f32 JAX (F.linear semantics: x @ W.T + b).
    # Weights are bf16 in the kernel, so the tolerance is loosened accordingly
    # (accumulation stays f32; error is bounded by bf16 weight/input rounding).
    x_flat = x.reshape(1, _IN)
    ref = jnp.maximum(x_flat @ w1.T + b1, 0.0) @ w2.T + b2
    assert y.shape == (1, _IN)
    assert jnp.allclose(y, ref, atol=5e-2, rtol=5e-2), (
        f"max abs err {jnp.max(jnp.abs(y - ref))}")

    print("KERNEL_OK")
</pallas_src>

<mosaic_0001>
module attributes {stable_mosaic.version = 11 : i64} {
  func.func @_mlp_kernel(%arg0: memref<1x48xf32, #tpu.memory_space<vmem>>, %arg1: memref<256x128xbf16, #tpu.memory_space<vmem>>, %arg2: memref<1x48xf32, #tpu.memory_space<vmem>>, %arg3: memref<1x128xf32, #tpu.memory_space<vmem>>) attributes {dimension_semantics = [], scalar_prefetch = 0 : i64, scratch_operands = 1 : i64, tpu.core_type = #tpu.core_type<tc>} {
    %cst = arith.constant 0.000000e+00 : f32
    %0 = vector.broadcast %cst : f32 to vector<1x128xf32>
    %c0 = arith.constant 0 : index
    %c0_0 = arith.constant 0 : index
    %1 = vector.load %arg3[%c0, %c0_0] : memref<1x128xf32, #tpu.memory_space<vmem>>, vector<1x128xf32>
    tpu.vector_store %arg3[%c0, %c0_0], %0 {strides = array<i32>} : memref<1x128xf32, #tpu.memory_space<vmem>>, vector<1x128xf32>,
    %c0_1 = arith.constant 0 : index
    %c0_2 = arith.constant 0 : index
    %2 = vector.load %arg0[%c0_1, %c0_2] : memref<1x48xf32, #tpu.memory_space<vmem>>, vector<1x48xf32>
    %c0_3 = arith.constant 0 : index
    %c0_4 = arith.constant 0 : index
    %3 = vector.load %arg3[%c0_3, %c0_4] : memref<1x128xf32, #tpu.memory_space<vmem>>, vector<1x48xf32>
    tpu.vector_store %arg3[%c0_3, %c0_4], %2 {strides = array<i32>} : memref<1x128xf32, #tpu.memory_space<vmem>>, vector<1x48xf32>,
    %4 = tpu.iota {dimensions = array<i32: 1>} : vector<1x128xi32>
    %c48_i32 = arith.constant 48 : i32
    %5 = vector.broadcast %c48_i32 : i32 to vector<1x128xi32>
    %6 = arith.cmpi eq, %4, %5 : vector<1x128xi32>
    %c0_5 = arith.constant 0 : index
    %c0_6 = arith.constant 0 : index
    %7 = vector.load %arg3[%c0_5, %c0_6] : memref<1x128xf32, #tpu.memory_space<vmem>>, vector<1x128xf32>
    %cst_7 = arith.constant 1.000000e+00 : f32
    %8 = vector.broadcast %cst_7 : f32 to vector<1x128xf32>
    %9 = arith.select %6, %8, %7 : vector<1x128xi1>, vector<1x128xf32>
    %10 = arith.truncf %9 : vector<1x128xf32> to vector<1x128xbf16>
    %c0_8 = arith.constant 0 : index
    %c0_9 = arith.constant 0 : index
    %11 = vector.load %arg1[%c0_8, %c0_9] : memref<256x128xbf16, #tpu.memory_space<vmem>>, vector<128x128xbf16>
    %c128 = arith.constant 128 : index
    %c0_10 = arith.constant 0 : index
    %12 = vector.load %arg1[%c128, %c0_10] : memref<256x128xbf16, #tpu.memory_space<vmem>>, vector<128x128xbf16>
    %cst_11 = arith.constant dense<0.000000e+00> : vector<1x128xf32>
    %13 = tpu.matmul %10, %11, %cst_11 {dimension_numbers = #tpu.dot_dimension_numbers<[1], [0], [0], [1], [0, 0, 1, 1], [], []>} : vector<1x128xbf16>, vector<128x128xbf16>, vector<1x128xf32> -> vector<1x128xf32>
    %cst_12 = arith.constant 0.000000e+00 : f32
    %14 = vector.broadcast %cst_12 : f32 to vector<1x128xf32>
    %15 = arith.maximumf %13, %14 : vector<1x128xf32>
    %16 = arith.truncf %15 : vector<1x128xf32> to vector<1x128xbf16>
    %cst_13 = arith.constant dense<0.000000e+00> : vector<1x128xf32>
    %17 = tpu.matmul %16, %12, %cst_13 {dimension_numbers = #tpu.dot_dimension_numbers<[1], [0], [0], [1], [0, 0, 1, 1], [], []>} : vector<1x128xbf16>, vector<128x128xbf16>, vector<1x128xf32> -> vector<1x128xf32>
    %18 = vector.extract_strided_slice %17 {offsets = [0, 0], sizes = [1, 48], strides = [1, 1]} : vector<1x128xf32> to vector<1x48xf32>
    %c0_14 = arith.constant 0 : index
    %c0_15 = arith.constant 0 : index
    %19 = vector.load %arg2[%c0_14, %c0_15] : memref<1x48xf32, #tpu.memory_space<vmem>>, vector<1x48xf32>
    tpu.vector_store %arg2[%c0_14, %c0_15], %18 {strides = array<i32>} : memref<1x48xf32, #tpu.memory_space<vmem>>, vector<1x48xf32>,
    return
  }
}

</mosaic_0001>

<bundles_post_ra>
// kernel: neuralnet_forward.1
= control target key start
LH: loop header
LB: loop body
LE: loop exit
PB: predicated region body
PF: predicated region fallthrough
CT: control target
= control target key end

     0   :  { %7 = vsyncpa [#allocation4], 0  ;;  %s435_s0 = inlined_call_operand.vmem [shape: f32[1,48], index: 0, kind: input, shape index: {}]   ;;  %s436_s1 = inlined_call_operand.hbm [shape: bf16[256,128], index: 1, kind: input, shape index: {}]   ;;  %s437_s2 = inlined_call_operand.hbm [shape: f32[1,48], index: 2, kind: output, shape index: {}]  }
   0x1   :  { %8 = vsyncpa [#allocation5], 0  ;;  %s403_s9 = smov [#allocation3]  }
   0x2   :  { %s16_s10 = sshll.u32 %s403_s9, 4  ;;  %s17_s10 = int_to_ptr.vmem [resolvable:$true] %s16_s10 }
   0x3   :  { %s367_s11 = scalar_lea.vmem %s17_s10, 2048  ;;  %p372_p1 = scmp.lt.s32.totalorder %s17_s10, %s17_s10 }
   0x4   :  { %p368_p0 = scmp.ne.s32.totalorder %s17_s10, %s367_s11  ;;  %p373_p2 = scmp.lt.s32.totalorder %s367_s11, %s367_s11 }
   0x6   :  { %p374_p3 = por %p373_p2, %p372_p1 }
   0x8   :  { %p375_p4 = pnand %p374_p3, %p368_p0 }
   0xa   :  { %378 = shalt.err (!%p375_p4)
}
   0xb   :  { %s404_s12 = smov 64   ;;  %s405_s13 = smov 4  }
   0xc   :  { %22 = dma.hbm_to_vmem [thread:$0]  %s436_s1, 2048, %s17_s10, [#allocation4], %s404_s12, %s404_s12, %s405_s13  }
   0xd   :  { %399 = dma.done.wait [#allocation4], 2048  }
   0xe   :  { %400 = vsyncadd [#allocation4], 4294965248  ;;  %v406_v0 = vmov 0.0   ;;  %vm407_vm0 = vmmov 0   ;;  %v343_v1 = vld [vmem:[#allocation3 + $0x38] sm:$0xff]   ;;  %v344_v2 = vld [vmem:[#allocation3 + $0x30] sm:$0xff]   ;;  %v31_v9 = vlaneseq }
   0xf   :  { %297 = vmatprep.subr.bf16.mxu0 %v406_v0  ;;  %27 = vst [vmem:[#allocation2] sm:$0x1] %v406_v0  ;;  %313 = vmatprep.mubr.msk.bf16.mxu0 %vm407_vm0, %v406_v0  ;;  %v345_v3 = vld [vmem:[#allocation3 + $0x28] sm:$0xff]   ;;  %vm29_vm1 = vcmask 385024   ;;  %v28_v4 = vld [vmem:[%s435_s0] sm:$0x1] }
  0x10   :  { %317 = vmatprep.subr.bf16.mxu1 %v406_v0  ;;  %333 = vmatprep.mubr.msk.bf16.mxu1 %vm407_vm0, %v406_v0  ;;  %30 = vst.msk [vmem:[#allocation2] sm:$0x1] %vm29_vm1, %v28_v4  ;;  %v351_v5 = vld [vmem:[#allocation3 + $0x78] sm:$0xff]   ;;  %v346_v6 = vld [vmem:[#allocation3 + $0x20] sm:$0xff]   ;;  %v352_v7 = vld [vmem:[#allocation3 + $0x70] sm:$0xff]   ;;  %v32_v12 = vand.u32 127, %v31_v9 }
  0x11   :  { %298 = vmatpush3.bf16.msra.mxu0 %v343_v1  ;;  %318 = vmatpush3.bf16.msra.mxu1 %v351_v5  ;;  %v347_v8 = vld [vmem:[#allocation3 + $0x18] sm:$0xff]   ;;  %v353_v10 = vld [vmem:[#allocation3 + $0x68] sm:$0xff]   ;;  %v348_v11 = vld [vmem:[#allocation3 + $0x10] sm:$0xff]   ;;  %s408_s0 = smov [#allocation6]  }
  0x12   :  { %299 = vmatprep.subr.bf16.mxu0 %v406_v0  ;;  %319 = vmatprep.subr.bf16.mxu1 %v406_v0  ;;  %v354_v13 = vld [vmem:[#allocation3 + $0x60] sm:$0xff]   ;;  %v349_v14 = vld [vmem:[#allocation3 + $0x8] sm:$0xff]   ;;  %vm33_vm2 = vcmp.eq.s32.totalorder %v32_v12, 48  ;;  %v355_v16 = vld [vmem:[#allocation3 + $0x58] sm:$0xff]   ;;  %s254_s1 = sshll.u32 %s408_s0, 4  ;;  %s255_s1 = int_to_ptr.vmem [resolvable:$true] %s254_s1 }
  0x13   :  { %v350_v17 = vld [vmem:[#allocation3] sm:$0xff]   ;;  %v356_v19 = vld [vmem:[#allocation3 + $0x50] sm:$0xff]   ;;  %v357_v21 = vld [vmem:[#allocation3 + $0x48] sm:$0xff]   ;;  %s379_s18 = scalar_lea.vmem %s255_s1, 16  ;;  %s383_s19 = scalar_lea.vmem %s255_s1, 32 }
  0x14   :  { %v358_v22 = vld [vmem:[#allocation3 + $0x40] sm:$0xff]   ;;  %p380_p5 = scmp.ne.s32.totalorder %s255_s1, %s379_s18  ;;  %p384_p6 = scmp.lt.s32.totalorder %s255_s1, %s255_s1 }
  0x15   :  { %300 = vmatpush3.bf16.msra.mxu0 %v344_v2  ;;  %320 = vmatpush3.bf16.msra.mxu1 %v352_v7  ;;  %p385_p7 = scmp.lt.s32.totalorder %s383_s19, %s379_s18 }
  0x16   :  { %301 = vmatprep.subr.bf16.mxu0 %v406_v0  ;;  %321 = vmatprep.subr.bf16.mxu1 %v406_v0 }
  0x17   :  { %v34_v15 = vld [vmem:[#allocation2] sm:$0x1]  ;;  %p386_p8 = por %p385_p7, %p384_p6 }
  0x18   :  { %v35_v18 = vsel %vm33_vm2, 1.0, %v34_v15 }
  0x19   :  { %302 = vmatpush3.bf16.msra.mxu0 %v345_v3  ;;  %322 = vmatpush3.bf16.msra.mxu1 %v353_v10  ;;  %v36_v20 = vpack.c.bf16 %v35_v18, %v35_v18  ;;  %p387_p9 = pnand %p386_p8, %p380_p5 }
  0x1a   :  { %303 = vmatprep.subr.bf16.mxu0 %v406_v0  ;;  %323 = vmatprep.subr.bf16.mxu1 %v406_v0 }
  0x1d   :  { %304 = vmatpush3.bf16.msra.mxu0 %v346_v6  ;;  %324 = vmatpush3.bf16.msra.mxu1 %v354_v13 }
  0x1e   :  { %305 = vmatprep.subr.bf16.mxu0 %v406_v0  ;;  %325 = vmatprep.subr.bf16.mxu1 %v406_v0 }
  0x21   :  { %306 = vmatpush3.bf16.msra.mxu0 %v347_v8  ;;  %326 = vmatpush3.bf16.msra.mxu1 %v355_v16 }
  0x22   :  { %307 = vmatprep.subr.bf16.mxu0 %v406_v0  ;;  %327 = vmatprep.subr.bf16.mxu1 %v406_v0 }
  0x25   :  { %308 = vmatpush3.bf16.msra.mxu0 %v348_v11  ;;  %328 = vmatpush3.bf16.msra.mxu1 %v356_v19 }
  0x26   :  { %309 = vmatprep.subr.bf16.mxu0 %v406_v0  ;;  %329 = vmatprep.subr.bf16.mxu1 %v406_v0 }
  0x29   :  { %310 = vmatpush3.bf16.msra.mxu0 %v349_v14  ;;  %330 = vmatpush3.bf16.msra.mxu1 %v357_v21 }
  0x2a   :  { %311 = vmatprep.subr.bf16.mxu0 %v406_v0  ;;  %331 = vmatprep.subr.bf16.mxu1 %v406_v0 }
  0x2d   :  { %312 = vmatpush3.bf16.msra.mxu0 %v350_v17  ;;  %332 = vmatpush3.bf16.msra.mxu1 %v358_v22 }
  0x30   :  { %314 = vmatmul.mubr.bf16.vlgmr.msra.gmra.mxu0 %v36_v20 }
  0xf0   :  { %v151_v23 = vpop.f32.mrf.mxu0 }
  0xf1   :  { %v157_v24 = vmax.f32 %v151_v23, 0.0 }
  0xf2   :  { %v315_v25 = vpop.f32.mrf.mxu0 }
  0xf3   :  { %v158_v26 = vpack.c.bf16 %v157_v24, %v157_v24 }
  0xf4   :  { %v154_v27 = vpop.f32.mrf.mxu0 }
  0xf5   :  { %334 = vmatmul.mubr.bf16.vlgmr.msra.gmra.mxu1 %v158_v26 }
  0xf6   :  { %v316_v28 = vpop.f32.mrf.mxu0 }
 0x1b5   :  { %v241_v29 = vpop.f32.mrf.mxu1 }
 0x1b6   :  { %247 = vst.msk [vmem:[#allocation6] sm:$0x1] %vm29_vm1, %v241_v29 }
 0x1b7   :  { %v335_v30 = vpop.f32.mrf.mxu1 }
 0x1b8   :  { %390 = shalt.err (!%p387_p9)
}
 0x1b9   :  { %257 = dma.vmem_to_hbm [thread:$0]  %s255_s1, 16, %s437_s2, [#allocation5]   ;;  %v244_v31 = vpop.f32.mrf.mxu1 }
 0x1bb   :  { %v336_v32 = vpop.f32.mrf.mxu1 }
 0x1bc   :  { %401 = dma.done.wait [#allocation5], 16  }
 0x1bd   :  { %402 = vsyncadd [#allocation5], 4294967280 }
 0x1be   :  { %261 = vsyncpa [#allocation4], 1 }
 0x1bf   :  { %262 = vsyncpa [#allocation5], 1 }

</bundles_post_ra>
